<compile_context>
chip_gen: v7x
topology: tpu7x:2x2x1
jax: 0.10.0
libtpu: 0.0.40
codegen_flags: <defaults>
</compile_context>

<pallas_src>
import functools

import jax
import jax.numpy as jnp
from jax import lax
from jax.experimental import pallas as pl
from jax.experimental.pallas import tpu as pltpu


def _prod(shape):
    p = 1
    for s in shape:
        p *= int(s)
    return p


def _round_up(x, m):
    return ((x + m - 1) // m) * m


def mlp_kernel(x_ref, w_ref, b_ref, gamma_ref, beta_ref, o_ref):
    # Linear: native-dtype operands, f32 accumulation on the MXU.
    y = jnp.dot(x_ref[...], w_ref[...], preferred_element_type=jnp.float32)
    y = y + b_ref[...].astype(jnp.float32)

    # LayerNorm over the feature axis (eps=1e-5, biased variance), f32 math.
    u = jnp.mean(y, axis=-1, keepdims=True)
    d = y - u
    s = jnp.mean(d * d, axis=-1, keepdims=True)
    y_norm = d * lax.rsqrt(s + 1e-5)          # rsqrt -> EUP, no per-elem divide
    y_ln = (gamma_ref[...].astype(jnp.float32) * y_norm
            + beta_ref[...].astype(jnp.float32))

    # ReLU + cast back to output dtype.
    o_ref[...] = jnp.maximum(y_ln, 0.0).astype(o_ref.dtype)


def _choose_tm(M, H, O, in_itemsize, vmem_budget_bytes=24 * 1024 * 1024):
    """Largest TM (multiple of 8, <=1024) whose working set fits the budget."""
    def est(tm):
        streamed = 2 * tm * (H + O) * in_itemsize      # double-buffered x, out
        resident = H * O * in_itemsize + 3 * O * 4     # W + bias/gamma/beta
        interm = 2 * tm * O * 4                        # f32 accumulator + LN temps
        return streamed + resident + interm

    tm = 1024
    while tm > 8 and est(tm) > vmem_budget_bytes:
        tm //= 2
    tm = max(tm, 8)
    # Don't tile larger than the (8-rounded) problem itself.
    return min(tm, _round_up(M, 8))


@functools.partial(jax.jit, static_argnames=())
def _identity(x):  # small helper to keep jit happy if needed (unused)
    return x


def mlp_forward(x, weight, bias, gamma, beta):
    """x: (..., H); weight: (O, H) (PyTorch Linear layout); bias/gamma/beta: (O,)."""
    orig_shape = x.shape
    H = int(orig_shape[-1])
    O = int(weight.shape[0])
    M = _prod(orig_shape[:-1])

    x2d = x.reshape(M, H)
    w_t = weight.T                       # (H, O)
    b2d = bias.reshape(1, O)
    g2d = gamma.reshape(1, O)
    be2d = beta.reshape(1, O)

    TM = _choose_tm(M, H, O, jnp.dtype(x.dtype).itemsize)
    Mp = _round_up(M, TM)
    if Mp != M:
        # Pad rows; padded rows produce garbage that is sliced off below
        # (LayerNorm is per-row, so padding never contaminates real rows).
        x2d = jnp.pad(x2d, ((0, Mp - M), (0, 0)))
    grid = (Mp // TM,)

    out2d = pl.pallas_call(
        mlp_kernel,
        out_shape=jax.ShapeDtypeStruct((Mp, O), x.dtype),
        grid_spec=pltpu.PrefetchScalarGridSpec(
            num_scalar_prefetch=0,
            grid=grid,
            in_specs=[
                # x tile streams over M (double-buffered by Pallas).
                pl.BlockSpec((TM, H), lambda i: (i, 0)),
                # Weight + params: same block index every step -> stay resident.
                pl.BlockSpec((H, O), lambda i: (0, 0)),
                pl.BlockSpec((1, O), lambda i: (0, 0)),
                pl.BlockSpec((1, O), lambda i: (0, 0)),
                pl.BlockSpec((1, O), lambda i: (0, 0)),
            ],
            out_specs=pl.BlockSpec((TM, O), lambda i: (i, 0)),
        ),
        compiler_params=pltpu.CompilerParams(
            # Each M tile is independent -> parallel (megacore on v7x).
            dimension_semantics=("parallel",),
            # Explicit, generation-safe scoped-VMEM budget (fits v7x's 64 MiB).
            vmem_limit_bytes=32 * 1024 * 1024,
        ),
    )(x2d, w_t, b2d, g2d, be2d)

    if Mp != M:
        out2d = out2d[:M]
    return out2d.reshape(orig_shape[:-1] + (O,))


if __name__ == "__main__":
    # Small shapes consistent with the module: hidden_size=32, out_features=32.
    # NOTE: at O=32 the lanes/MXU are ~25% utilized; real deployments should
    # keep the output feature dim a multiple of 128 for lane-dense stores.
    batch, seq, hidden, out_feat = 2, 8, 32, 32

    key = jax.random.PRNGKey(0)
    kx, kw, kb = jax.random.split(key, 3)

    x = jax.random.normal(kx, (batch, seq, hidden), dtype=jnp.float32)

    # Deterministic synthetic parameters (shapes from nn.Linear / LayerNorm).
    weight = jax.random.normal(kw, (out_feat, hidden), dtype=jnp.float32) * 0.1
    bias = jax.random.normal(kb, (out_feat,), dtype=jnp.float32) * 0.01
    gamma = jnp.ones((out_feat,), dtype=jnp.float32)   # LayerNorm weight init
    beta = jnp.zeros((out_feat,), dtype=jnp.float32)   # LayerNorm bias init

    out = mlp_forward(x, weight, bias, gamma, beta)
    out = jax.block_until_ready(out)

    # Pure-JAX reference check (same math as the PyTorch forward).
    y = x @ weight.T + bias
    u = y.mean(-1, keepdims=True)
    s = ((y - u) ** 2).mean(-1, keepdims=True)
    ref = jnp.maximum(gamma * ((y - u) / jnp.sqrt(s + 1e-5)) + beta, 0.0)
    assert jnp.allclose(out, ref, atol=1e-4, rtol=1e-4), "mismatch vs reference"

    print("KERNEL_OK")
</pallas_src>

<mosaic_0001>
module attributes {stable_mosaic.version = 11 : i64} {
  func.func @mlp_kernel(%arg0: i32, %arg1: memref<16x32xf32, #tpu.memory_space<vmem>>, %arg2: memref<32x32xf32, #tpu.memory_space<vmem>>, %arg3: memref<1x32xf32, #tpu.memory_space<vmem>>, %arg4: memref<1x32xf32, #tpu.memory_space<vmem>>, %arg5: memref<1x32xf32, #tpu.memory_space<vmem>>, %arg6: memref<16x32xf32, #tpu.memory_space<vmem>>) attributes {dimension_semantics = [#tpu.dimension_semantics<parallel>], iteration_bounds = array<i64: 1>, scalar_prefetch = 0 : i64, scratch_operands = 0 : i64, tpu.core_type = #tpu.core_type<tc>, window_params = [{transform_indices = @transform_0, window_bounds = array<i64: 16, 32>}, {pipeline_mode = #tpu.pipeline_mode<synchronous>, transform_indices = @transform_1, window_bounds = array<i64: 32, 32>}, {pipeline_mode = #tpu.pipeline_mode<synchronous>, transform_indices = @transform_2, window_bounds = array<i64: 1, 32>}, {pipeline_mode = #tpu.pipeline_mode<synchronous>, transform_indices = @transform_3, window_bounds = array<i64: 1, 32>}, {pipeline_mode = #tpu.pipeline_mode<synchronous>, transform_indices = @transform_4, window_bounds = array<i64: 1, 32>}, {transform_indices = @transform_5, window_bounds = array<i64: 16, 32>}]} {
    %c0 = arith.constant 0 : index
    %c0_0 = arith.constant 0 : index
    %0 = vector.load %arg1[%c0, %c0_0] : memref<16x32xf32, #tpu.memory_space<vmem>>, vector<16x32xf32>
    %c0_1 = arith.constant 0 : index
    %c0_2 = arith.constant 0 : index
    %1 = vector.load %arg2[%c0_1, %c0_2] : memref<32x32xf32, #tpu.memory_space<vmem>>, vector<32x32xf32>
    %cst = arith.constant dense<0.000000e+00> : vector<16x32xf32>
    %2 = tpu.matmul %0, %1, %cst {dimension_numbers = #tpu.dot_dimension_numbers<[1], [0], [0], [1], [0, 0, 1, 1], [], []>} : vector<16x32xf32>, vector<32x32xf32>, vector<16x32xf32> -> vector<16x32xf32>
    %c0_3 = arith.constant 0 : index
    %c0_4 = arith.constant 0 : index
    %3 = vector.load %arg3[%c0_3, %c0_4] : memref<1x32xf32, #tpu.memory_space<vmem>>, vector<1x32xf32>
    %4 = vector.broadcast %3 : vector<1x32xf32> to vector<16x32xf32>
    %5 = arith.addf %2, %4 : vector<16x32xf32>
    %cst_5 = arith.constant dense<0.000000e+00> : vector<16xf32>
    %6 = vector.multi_reduction <add>, %5, %cst_5 [1] : vector<16x32xf32> to vector<16xf32>
    %7 = vector.shape_cast %6 : vector<16xf32> to vector<16x1xf32>
    %cst_6 = arith.constant 3.200000e+01 : f32
    %8 = vector.broadcast %cst_6 : f32 to vector<16x1xf32>
    %9 = arith.divf %7, %8 : vector<16x1xf32>
    %10 = vector.broadcast %9 : vector<16x1xf32> to vector<16x32xf32>
    %11 = arith.subf %5, %10 : vector<16x32xf32>
    %12 = arith.mulf %11, %11 : vector<16x32xf32>
    %cst_7 = arith.constant dense<0.000000e+00> : vector<16xf32>
    %13 = vector.multi_reduction <add>, %12, %cst_7 [1] : vector<16x32xf32> to vector<16xf32>
    %14 = vector.shape_cast %13 : vector<16xf32> to vector<16x1xf32>
    %cst_8 = arith.constant 3.200000e+01 : f32
    %15 = vector.broadcast %cst_8 : f32 to vector<16x1xf32>
    %16 = arith.divf %14, %15 : vector<16x1xf32>
    %cst_9 = arith.constant 9.99999974E-6 : f32
    %17 = vector.broadcast %cst_9 : f32 to vector<16x1xf32>
    %18 = arith.addf %16, %17 : vector<16x1xf32>
    %19 = math.rsqrt %18 : vector<16x1xf32>
    %20 = vector.broadcast %19 : vector<16x1xf32> to vector<16x32xf32>
    %21 = arith.mulf %11, %20 : vector<16x32xf32>
    %c0_10 = arith.constant 0 : index
    %c0_11 = arith.constant 0 : index
    %22 = vector.load %arg4[%c0_10, %c0_11] : memref<1x32xf32, #tpu.memory_space<vmem>>, vector<1x32xf32>
    %23 = vector.broadcast %22 : vector<1x32xf32> to vector<16x32xf32>
    %24 = arith.mulf %23, %21 : vector<16x32xf32>
    %c0_12 = arith.constant 0 : index
    %c0_13 = arith.constant 0 : index
    %25 = vector.load %arg5[%c0_12, %c0_13] : memref<1x32xf32, #tpu.memory_space<vmem>>, vector<1x32xf32>
    %26 = vector.broadcast %25 : vector<1x32xf32> to vector<16x32xf32>
    %27 = arith.addf %24, %26 : vector<16x32xf32>
    %cst_14 = arith.constant 0.000000e+00 : f32
    %28 = vector.broadcast %cst_14 : f32 to vector<16x32xf32>
    %29 = arith.maximumf %27, %28 : vector<16x32xf32>
    %c0_15 = arith.constant 0 : index
    %c0_16 = arith.constant 0 : index
    %30 = vector.load %arg6[%c0_15, %c0_16] : memref<16x32xf32, #tpu.memory_space<vmem>>, vector<16x32xf32>
    tpu.vector_store %arg6[%c0_15, %c0_16], %29 {strides = array<i32>} : memref<16x32xf32, #tpu.memory_space<vmem>>, vector<16x32xf32>,
    return
  }
  func.func @transform_0(%arg0: i32) -> (i32, i32) {
    %c0_i32 = arith.constant 0 : i32
    %c0_i32_0 = arith.constant 0 : i32
    return %arg0, %c0_i32 : i32, i32
  }
  func.func @transform_1(%arg0: i32) -> (i32, i32) {
    %c0_i32 = arith.constant 0 : i32
    %c0_i32_0 = arith.constant 0 : i32
    %c0_i32_1 = arith.constant 0 : i32
    return %c0_i32, %c0_i32_0 : i32, i32
  }
  func.func @transform_2(%arg0: i32) -> (i32, i32) {
    %c0_i32 = arith.constant 0 : i32
    %c0_i32_0 = arith.constant 0 : i32
    %c0_i32_1 = arith.constant 0 : i32
    return %c0_i32, %c0_i32_0 : i32, i32
  }
  func.func @transform_3(%arg0: i32) -> (i32, i32) {
    %c0_i32 = arith.constant 0 : i32
    %c0_i32_0 = arith.constant 0 : i32
    %c0_i32_1 = arith.constant 0 : i32
    return %c0_i32, %c0_i32_0 : i32, i32
  }
  func.func @transform_4(%arg0: i32) -> (i32, i32) {
    %c0_i32 = arith.constant 0 : i32
    %c0_i32_0 = arith.constant 0 : i32
    %c0_i32_1 = arith.constant 0 : i32
    return %c0_i32, %c0_i32_0 : i32, i32
  }
  func.func @transform_5(%arg0: i32) -> (i32, i32) {
    %c0_i32 = arith.constant 0 : i32
    %c0_i32_0 = arith.constant 0 : i32
    return %arg0, %c0_i32 : i32, i32
  }
}

</mosaic_0001>

<bundles_post_ra>
// kernel: tpu_custom_call.1
= control target key start
LH: loop header
LB: loop body
LE: loop exit
PB: predicated region body
PF: predicated region fallthrough
CT: control target
= control target key end

     0   :  { %10 = vsyncpa [#allocation3], 0  ;;  %s419_s0 = inlined_call_operand.hbm [shape: f32[16,32], index: 0, kind: input, shape index: {}]   ;;  %s420_s1 = inlined_call_operand.hbm [shape: f32[32,32], index: 1, kind: input, shape index: {}]   ;;  %s421_s2 = inlined_call_operand.vmem [shape: f32[1,32], index: 2, kind: input, shape index: {}]   ;;  %s422_s3 = inlined_call_operand.vmem [shape: f32[1,32], index: 3, kind: input, shape index: {}]   ;;  %s423_s4 = inlined_call_operand.vmem [shape: f32[1,32], index: 4, kind: input, shape index: {}]   ;;  %s424_s5 = inlined_call_operand.hbm [shape: f32[16,32], index: 5, kind: output, shape index: {}]  }
   0x1   :  { %11 = vsyncpa [#allocation6], 0 }
   0x2   :  { %12 = vsyncpa [#allocation4], 0  ;;  %s322_s18 = smov [#allocation2]   ;;  %s250_s22 = scalar_lea.hbm %s419_s0, 256 }
   0x3   :  { %s18_s19 = sshll.u32 %s322_s18, 4  ;;  %p251_p0 = scmp.ne.s32.totalorder %s419_s0, %s250_s22  ;;  %s19_s19 = int_to_ptr.vmem [resolvable:$true] %s18_s19 }
   0x4   :  { %p254_p1 = scmp.lt.u32.totalorder %s250_s22, %s419_s0 }
   0x6   :  { %p256_p2 = pnand %p254_p1, %p251_p0 }
   0x8   :  { %259 = shalt.err (!%p256_p2)
}
   0x9   :  { %s260_s27 = scalar_lea.vmem %s19_s19, 256  ;;  %p265_p4 = scmp.lt.s32.totalorder %s19_s19, %s19_s19 }
   0xa   :  { %p261_p3 = scmp.ne.s32.totalorder %s19_s19, %s260_s27  ;;  %p266_p5 = scmp.lt.s32.totalorder %s260_s27, %s260_s27 }
   0xc   :  { %p267_p6 = por %p266_p5, %p265_p4 }
   0xe   :  { %p268_p7 = pnand %p267_p6, %p261_p3 }
  0x10   :  { %271 = shalt.err (!%p268_p7)
}
  0x11   :  { %s323_s28 = smov 128   ;;  %s324_s29 = smov 8  }
  0x12   :  { %24 = dma.hbm_to_vmem [thread:$0]  %s419_s0, 256, %s19_s19, [#allocation3], %s323_s28, %s323_s28, %s324_s29  }
  0x13   :  { %s325_s7 = smov [#allocation5]   ;;  %s272_s11 = scalar_lea.hbm %s420_s1, 512 }
  0x14   :  { %s30_s8 = sshll.u32 %s325_s7, 4  ;;  %p273_p8 = scmp.ne.s32.totalorder %s420_s1, %s272_s11  ;;  %s31_s8 = int_to_ptr.vmem [resolvable:$true] %s30_s8 }
  0x15   :  { %p276_p9 = scmp.lt.u32.totalorder %s272_s11, %s420_s1 }
  0x17   :  { %p278_p10 = pnand %p276_p9, %p273_p8 }
  0x19   :  { %281 = shalt.err (!%p278_p10)
}
  0x1a   :  { %s282_s16 = scalar_lea.vmem %s31_s8, 512  ;;  %p287_p12 = scmp.lt.s32.totalorder %s31_s8, %s31_s8 }
  0x1b   :  { %p283_p11 = scmp.ne.s32.totalorder %s31_s8, %s282_s16  ;;  %p288_p13 = scmp.lt.s32.totalorder %s282_s16, %s282_s16 }
  0x1d   :  { %p289_p0 = por %p288_p13, %p287_p12 }
  0x1f   :  { %p290_p1 = pnand %p289_p0, %p283_p11 }
  0x21   :  { %293 = shalt.err (!%p290_p1)
}
  0x22   :  { %36 = dma.hbm_to_vmem [thread:$0]  %s420_s1, 512, %s31_s8, [#allocation6], %s323_s28, %s323_s28, %s324_s29  }
  0x23   :  { %316 = dma.done.wait [#allocation3], 256  }
  0x24   :  { %317 = vsyncadd [#allocation3], 4294967040 }
  0x25   :  { %318 = dma.done.wait [#allocation6], 512  }
  0x26   :  { %319 = vsyncadd [#allocation6], 4294966784  ;;  %vm62_vm0 = vcmask 261120   ;;  %v51_v0 = vld [vmem:[#allocation5] sm:$0xff]  ;;  %v52_v1 = vld [vmem:[#allocation5 + $0x8] sm:$0xff]  ;;  %s326_s22 = smov [#allocation7]  }
  0x27   :  { %v53_v2 = vld [vmem:[#allocation5 + $0x10] sm:$0xff]  ;;  %v233_v3 = vpack.c.bf16 %v52_v1, %v51_v0  ;;  %v54_v4 = vld [vmem:[#allocation5 + $0x18] sm:$0xff]  ;;  %s198_s23 = sshll.u32 %s326_s22, 4  ;;  %s199_s23 = int_to_ptr.vmem [resolvable:$true] %s198_s23 }
  0x28   :  { %v49_v5 = vld [vmem:[#allocation2] sm:$0xff]  ;;  %v237_v6 = vpack.c.bf16 %v54_v4, %v53_v2  ;;  %v50_v7 = vld [vmem:[#allocation2 + $0x8] sm:$0xff]  ;;  %p299_p3 = scmp.lt.s32.totalorder %s199_s23, %s199_s23 }
  0x29   :  { %230 = vmatprep.mubr.msk.f32.mxu0 %vm62_vm0, %v49_v5  ;;  %234 = vmatprep.subr.bf16.mxu0 %v233_v3  ;;  %v211_v8 = vld [vmem:[%s421_s2] ss:$0 sm:$0xff] }
  0x2a   :  { %236 = vmatpush3.bf16.msra.mxu0 %v233_v3  ;;  %v214_v32 = vld [vmem:[%s422_s3] ss:$0 sm:$0xff]  ;;  %s294_s3 = scalar_lea.vmem %s199_s23, 256 }
  0x2b   :  { %238 = vmatprep.subr.bf16.mxu0 %v237_v6  ;;  %v215_v34 = vld [vmem:[%s423_s4] ss:$0 sm:$0xff]  ;;  %p295_p2 = scmp.ne.s32.totalorder %s199_s23, %s294_s3  ;;  %p300_p4 = scmp.lt.s32.totalorder %s294_s3, %s294_s3 }
  0x2d   :  { %p301_p5 = por %p300_p4, %p299_p3 }
  0x2e   :  { %240 = vmatpush3.bf16.msra.mxu0 %v237_v6 }
  0x2f   :  { %p302_p6 = pnand %p301_p5, %p295_p2 }
  0x31   :  { %231 = vmatmul.mubr.msk.f32.vlgmr.msra.gmra.mrb[0].mxu0 %vm62_vm0, %v50_v7 }
 0x104   :  { %v232_v9 = vpop.f32.mrb[0].mxu0 }
 0x105   :  { %v135_v10 = vpop.f32.mrb[1].mxu0  ;;  %v141_v12 = vadd.f32 %v232_v9, %v211_v8 }
 0x106   :  { %v136_v11 = vadd.f32 %v211_v8, %v135_v10 }
 0x107   :  { %v147_v14 = vsel %vm62_vm0, %v141_v12, 0.0 }
 0x108   :  { %v144_v13 = vsel %vm62_vm0, %v136_v11, 0.0 }
 0x109   :  { %145 = vadd.xlane.f32.xlu0 %v144_v13 }
 0x10d   :  { %148 = vadd.xlane.f32.xlu0 %v147_v14 }
 0x196   :  { %v146_v15 = vpop.xlane.xlu0 %145 }
 0x197   :  { %v151_v16 = vmul.f32 0.03125, %v146_v15 }
 0x199   :  { %v153_v17 = vsub.f32 %v136_v11, %v151_v16 }
 0x19a   :  { %v149_v18 = vpop.xlane.xlu0 %148 }
 0x19b   :  { %v152_v19 = vmul.f32 0.03125, %v149_v18  ;;  %v155_v20 = vmul.f32 %v153_v17, %v153_v17 }
 0x19d   :  { %v154_v21 = vsub.f32 %v141_v12, %v152_v19  ;;  %v157_v22 = vsel %vm62_vm0, %v155_v20, 0.0 }
 0x19e   :  { %158 = vadd.xlane.f32.xlu1 %v157_v22 }
 0x19f   :  { %v156_v23 = vmul.f32 %v154_v21, %v154_v21 }
 0x1a1   :  { %v160_v24 = vsel %vm62_vm0, %v156_v23, 0.0 }
 0x1a2   :  { %161 = vadd.xlane.f32.xlu1 %v160_v24 }
 0x22b   :  { %v159_v25 = vpop.xlane.xlu1 %158 }
 0x22c   :  { %v163_v26 = vmul.f32 0.03125, %v159_v25 }
 0x22e   :  { %v165_v27 = vadd.f32 1e-05, %v163_v26 }
 0x22f   :  { %v162_v28 = vpop.xlane.xlu1 %161 }
 0x230   :  { %246 = vrsqrt.f32 %v165_v27  ;;  %v164_v29 = vmul.f32 0.03125, %v162_v28 }
 0x232   :  { %v166_v30 = vadd.f32 1e-05, %v164_v29 }
 0x234   :  { %248 = vrsqrt.f32 %v166_v30 }
 0x23a   :  { %v247_v31 = vpop.eup %246 }
 0x23b   :  { %v169_v33 = vmul.f32 %v247_v31, %v153_v17 }
 0x23d   :  { %v178_v35 = vmul.f32 %v214_v32, %v169_v33 }
 0x23e   :  { %v249_v36 = vpop.eup %248 }
 0x23f   :  { %v170_v37 = vmul.f32 %v249_v36, %v154_v21  ;;  %v187_v38 = vadd.f32 %v215_v34, %v178_v35 }
 0x241   :  { %v179_v39 = vmul.f32 %v214_v32, %v170_v37  ;;  %v189_v40 = vmax.f32 %v187_v38, 0.0 }
 0x243   :  { %v188_v41 = vadd.f32 %v215_v34, %v179_v39  ;;  %191 = vst.msk [vmem:[#allocation7] sm:$0xff] %vm62_vm0, %v189_v40 }
 0x245   :  { %v190_v42 = vmax.f32 %v188_v41, 0.0 }
 0x247   :  { %192 = vst.msk [vmem:[#allocation7 + $0x8] sm:$0xff] %vm62_vm0, %v190_v42 }
 0x248   :  { %305 = shalt.err (!%p302_p6)
}
 0x249   :  { %s306_s25 = scalar_lea.hbm %s424_s5, 256 }
 0x24a   :  { %p307_p7 = scmp.ne.s32.totalorder %s424_s5, %s306_s25  ;;  %p310_p8 = scmp.lt.u32.totalorder %s306_s25, %s424_s5 }
 0x24c   :  { %p312_p9 = pnand %p310_p8, %p307_p7 }
 0x24e   :  { %315 = shalt.err (!%p312_p9)
}
 0x24f   :  { %204 = dma.vmem_to_hbm [thread:$0]  %s199_s23, 256, %s424_s5, [#allocation4], %s323_s28, %s323_s28, %s324_s29  }
 0x250   :  { %320 = dma.done.wait [#allocation4], 256  }
 0x251   :  { %321 = vsyncadd [#allocation4], 4294967040 }
 0x252   :  { %208 = vsyncpa [#allocation3], 1 }
 0x253   :  { %209 = vsyncpa [#allocation6], 1 }
 0x254   :  { %210 = vsyncpa [#allocation4], 1 }

</bundles_post_ra>
